<compile_context>
chip_gen: v5e
topology: v5e:2x2
jax: 0.10.0
libtpu: 0.0.40
codegen_flags: <defaults>
</compile_context>

<pallas_src>
import jax
import jax.numpy as jnp
from jax.experimental import pallas as pl
from jax.experimental.pallas import tpu as pltpu

LANE = 128      # lane (last-dim) width of a vreg
SUBLANE = 8     # sublane (second-to-last) width for f32


def _round_up(n, m):
    return ((n + m - 1) // m) * m


def _pick_batch_tile(batch, cap=1024):
    """Batch tile: big (amortize per-step overhead), but split into >= 2 grid
    steps when the batch allows it so v7x's two TensorCores both run; always a
    multiple of the 8-row f32 sublane."""
    if batch <= 2 * SUBLANE:
        return _round_up(max(batch, 1), SUBLANE)
    n_tiles = max(2, pl.cdiv(batch, cap))
    return _round_up(pl.cdiv(batch, n_tiles), SUBLANE)


def _linear_qnet_kernel(x_ref, w1_ref, b1_ref, w3_ref, b3_ref, o_ref):
    # Cast x to bf16 in-kernel (VPU) so both MXU operands are bf16.
    x = x_ref[...].astype(jnp.bfloat16)
    # fc1: bf16 x @ bf16 W1 on the MXU, f32 accumulation.
    h = jnp.dot(x, w1_ref[...], preferred_element_type=jnp.float32)
    # Bias add + ReLU in f32 on the VPU (do NOT downcast before the ReLU).
    h = jnp.maximum(h + b1_ref[...], 0.0)
    # fc3: cast activations to bf16 only as MXU input; accumulate in f32.
    y = jnp.dot(h.astype(jnp.bfloat16), w3_ref[...],
                preferred_element_type=jnp.float32)
    o_ref[...] = (y + b3_ref[...]).astype(o_ref.dtype)


def linear_qnet_forward(x, w1, b1, w3, b3, *, block_batch=1024):
    """Fused fc1 -> ReLU -> fc3.

    x : (B, in_size)        float32 (unpadded)
    w1: (in_size, hid_pad)  bfloat16, hid zero-padded to a lane multiple
    b1: (1, hid_pad)        float32,  zero-padded
    w3: (hid_pad, out_size) bfloat16, hid rows zero-padded (out unpadded)
    b3: (1, out_size)       float32
    Returns (B, out_size) float32.
    """
    B, in_size = x.shape
    hid_pad = w1.shape[1]
    out_size = w3.shape[1]

    tb = _pick_batch_tile(B, block_batch)
    grid = (pl.cdiv(B, tb),)   # ragged final tile handled by Pallas (masked)

    flops = 2 * B * (in_size * hid_pad + hid_pad * out_size)
    bytes_accessed = (x.size * x.dtype.itemsize
                      + w1.size * w1.dtype.itemsize
                      + w3.size * w3.dtype.itemsize
                      + b1.size * b1.dtype.itemsize
                      + b3.size * b3.dtype.itemsize
                      + B * out_size * 4)

    # VMEM budget from actual buffer sizes (double-buffered x/out tiles,
    # resident weights/biases) + generous compiler-scratch headroom.
    buf_bytes = 2 * (tb * in_size * 4 + tb * out_size * 4
                     + w1.size * 2 + w3.size * 2
                     + b1.size * 4 + b3.size * 4)
    vmem_limit = int(min(max(2 * buf_bytes + (8 << 20), 16 << 20), 48 << 20))

    out = pl.pallas_call(
        _linear_qnet_kernel,
        out_shape=jax.ShapeDtypeStruct((B, out_size), jnp.float32),
        grid=grid,
        in_specs=[
            # x: tiled over the batch grid axis (software-pipelined DMA).
            # Last block dim == full array dim, so no 128-lane padding needed.
            pl.BlockSpec((tb, in_size), lambda i: (i, 0)),
            # Weights / biases: same block every step -> stay VMEM-resident.
            pl.BlockSpec((in_size, hid_pad), lambda i: (0, 0)),
            pl.BlockSpec((1, hid_pad), lambda i: (0, 0)),
            pl.BlockSpec((hid_pad, out_size), lambda i: (0, 0)),
            pl.BlockSpec((1, out_size), lambda i: (0, 0)),
        ],
        # Output written at its natural (B, out_size) shape: tiny HBM write,
        # no padded columns, no trailing slice kernel.
        out_specs=pl.BlockSpec((tb, out_size), lambda i: (i, 0)),
        compiler_params=pltpu.CompilerParams(
            dimension_semantics=("parallel",),   # megacore-shard batch on v7x
            vmem_limit_bytes=vmem_limit,
        ),
        cost_estimate=pl.CostEstimate(
            flops=flops, transcendentals=0, bytes_accessed=bytes_accessed),
    )(x, w1, b1, w3, b3)

    return out


def init_params(key, input_size, hidden_size2, output_size):
    """nn.Linear-style init (uniform +-1/sqrt(fan_in)), stored pre-transposed
    as (in, out). Only the hidden dim is zero-padded to a 128-lane multiple;
    input / output dims stay at their natural sizes. Weights in bf16."""
    hid_pad = _round_up(hidden_size2, LANE)

    k1, k2, k3, k4 = jax.random.split(key, 4)
    bound1 = 1.0 / float(input_size) ** 0.5
    w1 = jax.random.uniform(k1, (input_size, hidden_size2), jnp.float32,
                            -bound1, bound1)
    b1 = jax.random.uniform(k2, (hidden_size2,), jnp.float32, -bound1, bound1)
    bound3 = 1.0 / float(hidden_size2) ** 0.5
    w3 = jax.random.uniform(k3, (hidden_size2, output_size), jnp.float32,
                            -bound3, bound3)
    b3 = jax.random.uniform(k4, (output_size,), jnp.float32, -bound3, bound3)

    w1p = jnp.zeros((input_size, hid_pad), jnp.bfloat16)
    w1p = w1p.at[:, :hidden_size2].set(w1.astype(jnp.bfloat16))
    b1p = jnp.zeros((1, hid_pad), jnp.float32).at[0, :hidden_size2].set(b1)
    w3p = jnp.zeros((hid_pad, output_size), jnp.bfloat16)
    w3p = w3p.at[:hidden_size2, :].set(w3.astype(jnp.bfloat16))
    b3p = b3.reshape(1, output_size)

    return (w1p, b1p, w3p, b3p), (w1, b1, w3, b3)


if __name__ == "__main__":
    # Small shapes consistent with the module: (batch, inputSize) -> (batch, outputSize)
    batch, input_size, hidden1, hidden2, output_size = 8, 32, 64, 64, 4  # hidden1 unused, as in the module

    key = jax.random.PRNGKey(0)
    kx, kp = jax.random.split(key)
    x = jax.random.normal(kx, (batch, input_size), jnp.float32)
    (w1p, b1p, w3p, b3p), (w1, b1, w3, b3) = init_params(
        kp, input_size, hidden2, output_size)

    y = linear_qnet_forward(x, w1p, b1p, w3p, b3p)
    y = jax.block_until_ready(y)
    assert y.shape == (batch, output_size)

    # Pure-JAX reference matching the kernel's precision path
    # (bf16 MXU inputs, f32 accumulation, f32 bias/ReLU).
    xb = x.astype(jnp.bfloat16).astype(jnp.float32)
    w1b = w1.astype(jnp.bfloat16).astype(jnp.float32)
    w3b = w3.astype(jnp.bfloat16).astype(jnp.float32)
    h = jnp.maximum(
        jnp.dot(xb, w1b, precision=jax.lax.Precision.HIGHEST) + b1, 0.0)
    hb = h.astype(jnp.bfloat16).astype(jnp.float32)
    ref = jnp.dot(hb, w3b, precision=jax.lax.Precision.HIGHEST) + b3

    assert jnp.allclose(y, ref, atol=1e-2, rtol=1e-2), \
        float(jnp.max(jnp.abs(y - ref)))

    print("KERNEL_OK")
</pallas_src>

<mosaic_0001>
module attributes {stable_mosaic.version = 11 : i64} {
  func.func @_linear_qnet_kernel(%arg0: i32, %arg1: memref<8x32xf32, #tpu.memory_space<vmem>>, %arg2: memref<32x128xbf16, #tpu.memory_space<vmem>>, %arg3: memref<1x128xf32, #tpu.memory_space<vmem>>, %arg4: memref<128x4xbf16, #tpu.memory_space<vmem>>, %arg5: memref<1x4xf32, #tpu.memory_space<vmem>>, %arg6: memref<8x4xf32, #tpu.memory_space<vmem>>) attributes {dimension_semantics = [#tpu.dimension_semantics<parallel>], iteration_bounds = array<i64: 1>, scalar_prefetch = 0 : i64, scratch_operands = 0 : i64, tpu.core_type = #tpu.core_type<tc>, window_params = [{transform_indices = @transform_0, window_bounds = array<i64: 8, 32>}, {pipeline_mode = #tpu.pipeline_mode<synchronous>, transform_indices = @transform_1, window_bounds = array<i64: 32, 128>}, {pipeline_mode = #tpu.pipeline_mode<synchronous>, transform_indices = @transform_2, window_bounds = array<i64: 1, 128>}, {pipeline_mode = #tpu.pipeline_mode<synchronous>, transform_indices = @transform_3, window_bounds = array<i64: 128, 4>}, {pipeline_mode = #tpu.pipeline_mode<synchronous>, transform_indices = @transform_4, window_bounds = array<i64: 1, 4>}, {transform_indices = @transform_5, window_bounds = array<i64: 8, 4>}]} {
    %c0 = arith.constant 0 : index
    %c0_0 = arith.constant 0 : index
    %0 = vector.load %arg1[%c0, %c0_0] : memref<8x32xf32, #tpu.memory_space<vmem>>, vector<8x32xf32>
    %1 = arith.truncf %0 : vector<8x32xf32> to vector<8x32xbf16>
    %c0_1 = arith.constant 0 : index
    %c0_2 = arith.constant 0 : index
    %2 = vector.load %arg2[%c0_1, %c0_2] : memref<32x128xbf16, #tpu.memory_space<vmem>>, vector<32x128xbf16>
    %cst = arith.constant dense<0.000000e+00> : vector<8x128xf32>
    %3 = tpu.matmul %1, %2, %cst {dimension_numbers = #tpu.dot_dimension_numbers<[1], [0], [0], [1], [0, 0, 1, 1], [], []>} : vector<8x32xbf16>, vector<32x128xbf16>, vector<8x128xf32> -> vector<8x128xf32>
    %c0_3 = arith.constant 0 : index
    %c0_4 = arith.constant 0 : index
    %4 = vector.load %arg3[%c0_3, %c0_4] : memref<1x128xf32, #tpu.memory_space<vmem>>, vector<1x128xf32>
    %5 = vector.broadcast %4 : vector<1x128xf32> to vector<8x128xf32>
    %6 = arith.addf %3, %5 : vector<8x128xf32>
    %cst_5 = arith.constant 0.000000e+00 : f32
    %7 = vector.broadcast %cst_5 : f32 to vector<8x128xf32>
    %8 = arith.maximumf %6, %7 : vector<8x128xf32>
    %9 = arith.truncf %8 : vector<8x128xf32> to vector<8x128xbf16>
    %c0_6 = arith.constant 0 : index
    %c0_7 = arith.constant 0 : index
    %10 = vector.load %arg4[%c0_6, %c0_7] : memref<128x4xbf16, #tpu.memory_space<vmem>>, vector<128x4xbf16>
    %cst_8 = arith.constant dense<0.000000e+00> : vector<8x4xf32>
    %11 = tpu.matmul %9, %10, %cst_8 {dimension_numbers = #tpu.dot_dimension_numbers<[1], [0], [0], [1], [0, 0, 1, 1], [], []>} : vector<8x128xbf16>, vector<128x4xbf16>, vector<8x4xf32> -> vector<8x4xf32>
    %c0_9 = arith.constant 0 : index
    %c0_10 = arith.constant 0 : index
    %12 = vector.load %arg5[%c0_9, %c0_10] : memref<1x4xf32, #tpu.memory_space<vmem>>, vector<1x4xf32>
    %13 = vector.broadcast %12 : vector<1x4xf32> to vector<8x4xf32>
    %14 = arith.addf %11, %13 : vector<8x4xf32>
    %c0_11 = arith.constant 0 : index
    %c0_12 = arith.constant 0 : index
    %15 = vector.load %arg6[%c0_11, %c0_12] : memref<8x4xf32, #tpu.memory_space<vmem>>, vector<8x4xf32>
    tpu.vector_store %arg6[%c0_11, %c0_12], %14 {strides = array<i32>} : memref<8x4xf32, #tpu.memory_space<vmem>>, vector<8x4xf32>,
    return
  }
  func.func @transform_0(%arg0: i32) -> (i32, i32) {
    %c0_i32 = arith.constant 0 : i32
    %c0_i32_0 = arith.constant 0 : i32
    return %arg0, %c0_i32 : i32, i32
  }
  func.func @transform_1(%arg0: i32) -> (i32, i32) {
    %c0_i32 = arith.constant 0 : i32
    %c0_i32_0 = arith.constant 0 : i32
    %c0_i32_1 = arith.constant 0 : i32
    return %c0_i32, %c0_i32_0 : i32, i32
  }
  func.func @transform_2(%arg0: i32) -> (i32, i32) {
    %c0_i32 = arith.constant 0 : i32
    %c0_i32_0 = arith.constant 0 : i32
    %c0_i32_1 = arith.constant 0 : i32
    return %c0_i32, %c0_i32_0 : i32, i32
  }
  func.func @transform_3(%arg0: i32) -> (i32, i32) {
    %c0_i32 = arith.constant 0 : i32
    %c0_i32_0 = arith.constant 0 : i32
    %c0_i32_1 = arith.constant 0 : i32
    return %c0_i32, %c0_i32_0 : i32, i32
  }
  func.func @transform_4(%arg0: i32) -> (i32, i32) {
    %c0_i32 = arith.constant 0 : i32
    %c0_i32_0 = arith.constant 0 : i32
    %c0_i32_1 = arith.constant 0 : i32
    return %c0_i32, %c0_i32_0 : i32, i32
  }
  func.func @transform_5(%arg0: i32) -> (i32, i32) {
    %c0_i32 = arith.constant 0 : i32
    %c0_i32_0 = arith.constant 0 : i32
    return %arg0, %c0_i32 : i32, i32
  }
}

</mosaic_0001>

<bundles_post_ra>
// kernel: tpu_custom_call.1
= control target key start
LH: loop header
LB: loop body
LE: loop exit
PB: predicated region body
PF: predicated region fallthrough
CT: control target
= control target key end

     0   :  { %vm43_vm0 = vcmask 261120   ;;  %vm143_vm1 = vcmask 31744   ;;  %s274_s1 = inlined_call_operand.vmem [shape: bf16[32,128], index: 1, kind: input, shape index: {}]   ;;  %s275_s0 = inlined_call_operand.vmem [shape: f32[8,32], index: 0, kind: input, shape index: {}]   ;;  %s276_s3 = inlined_call_operand.vmem [shape: bf16[128,4], index: 3, kind: input, shape index: {}]   ;;  %s277_s2 = inlined_call_operand.vmem [shape: f32[1,128], index: 2, kind: input, shape index: {}]   ;;  %s278_s4 = inlined_call_operand.vmem [shape: f32[1,4], index: 4, kind: input, shape index: {}]   ;;  %s279_s5 = inlined_call_operand.vmem [shape: f32[8,4], index: 5, kind: output, shape index: {}]  }
   0x1   :  { %v191_v0 = vld [vmem:[%s274_s1 + $0x8] sm:$0xff]  ;;  %v199_v1 = vld [vmem:[%s276_s3 + $0x38] sm:$0xff]  ;;  %v190_v2 = vld [vmem:[%s274_s1] sm:$0xff] }
   0x2   :  { %53 = vmatpush.bf16.msra.mxu0 %v191_v0  ;;  %v21_v3 = vld [vmem:[%s275_s0] sm:$0xff]  ;;  %130 = vmatpush.bf16.msra.mxu1 %v199_v1  ;;  %v198_v4 = vld [vmem:[%s276_s3 + $0x30] sm:$0xff]  ;;  %v197_v6 = vld [vmem:[%s276_s3 + $0x28] sm:$0xff] }
   0x3   :  { %v22_v5 = vpack.c.bf16 %v21_v3, %v21_v3  ;;  %v196_v7 = vld [vmem:[%s276_s3 + $0x20] sm:$0xff]  ;;  %v195_v8 = vld [vmem:[%s276_s3 + $0x18] sm:$0xff]  ;;  %v194_v9 = vld [vmem:[%s276_s3 + $0x10] sm:$0xff] }
   0x4   :  { %v193_v10 = vld [vmem:[%s276_s3 + $0x8] sm:$0xff]  ;;  %v192_v11 = vld [vmem:[%s276_s3] sm:$0xff] }
   0x5   :  { %v200_v12 = vld [vmem:[%s277_s2] ss:$0 sm:$0xff] }
   0x6   :  { %54 = vmatpush.bf16.msra.mxu0 %v190_v2  ;;  %131 = vmatpush.bf16.msra.mxu1 %v198_v4  ;;  %v201_v18 = vld [vmem:[%s278_s4] ss:$0 sm:$0xff] }
   0x9   :  { %157 = vmatmul.msk.bf16.vlgmr.msra.gmra.mxu0 %vm43_vm0, %v22_v5 }
   0xa   :  { %132 = vmatpush.bf16.msra.mxu1 %v197_v6 }
   0xe   :  { %133 = vmatpush.bf16.msra.mxu1 %v196_v7 }
  0x12   :  { %134 = vmatpush.bf16.msra.mxu1 %v195_v8 }
  0x16   :  { %135 = vmatpush.bf16.msra.mxu1 %v194_v9 }
  0x1a   :  { %136 = vmatpush.bf16.msra.mxu1 %v193_v10 }
  0x1e   :  { %137 = vmatpush.bf16.msra.mxu1 %v192_v11 }
  0x86   :  { %v56_v13 = vpop.f32.mrf.mxu0 }
  0x87   :  { %v57_v14 = vadd.f32 %v200_v12, %v56_v13 }
  0x89   :  { %v60_v15 = vmax.f32 %v57_v14, 0.0 }
  0x8b   :  { %v61_v16 = vpack.c.bf16 %v60_v15, %v60_v15 }
  0x8d   :  { %138 = vmatmul.bf16.vlgmr.msra.gmra.mxu1 %v61_v16 }
  0x8e   :  { %v58_v17 = vpop.f32.mrf.mxu0 }
 0x10a   :  { %v139_v19 = vpop.f32.mrf.mxu1 }
 0x10b   :  { %v140_v20 = vadd.f32 %v201_v18, %v139_v19 }
 0x10d   :  { %144 = vst.msk [vmem:[%s279_s5] sm:$0xff] %vm143_vm1, %v140_v20 }
 0x112   :  { %v141_v21 = vpop.f32.mrf.mxu1 }

</bundles_post_ra>
